<compile_context>
chip_gen: v6e
topology: v6e:2x2x1
jax: 0.10.0
libtpu: 0.0.40
codegen_flags: <defaults>
</compile_context>

<pallas_src>
import functools
import math

import jax
import jax.numpy as jnp
from jax.experimental import pallas as pl
from jax.experimental.pallas import tpu as pltpu


# ------------------------------ in-kernel helpers ---------------------------- #

def _layer_norm(x, eps=1e-5):
    """Default nn.LayerNorm (weight=1, bias=0); fused single-pass statistics."""
    m1 = jnp.mean(x, axis=-1, keepdims=True)
    m2 = jnp.mean(x * x, axis=-1, keepdims=True)
    var = m2 - m1 * m1
    return (x - m1) * jax.lax.rsqrt(var + eps)


# --------------------------------- fused kernel ------------------------------ #

def _make_kernel(S, E, H):
    d = E // H

    def kernel(src_ref, p_ref, w_ref, out_ref):
        # 1) positional encoding (dropout = identity in eval mode): broadcast add.
        x = src_ref[0] + p_ref[...]                                        # (S, E)

        # 2) one concatenated QKV projection on the MXU.  The 1/sqrt(E) attention
        #    scale is already folded into the Wq columns at host packing time.
        qkv = jnp.dot(x, w_ref[...], preferred_element_type=jnp.float32)   # (S, 3E)

        # 3) transpose_qkv (the module's (B,S,H,d)->permute->(B,S,E) reshuffle):
        #       out[s', j*d:(j+1)*d] = proj[(s'*H+j) % S, ((s'*H+j)//S)*d : +d]
        #    Built from static slice copies + concatenation only — no permutation
        #    matmul, no lane<->sublane reshape, no big temporaries.
        heads = [[qkv[:, t * E + h * d: t * E + (h + 1) * d]               # (S, d)
                  for h in range(H)] for t in range(3)]

        def fold(t):
            rows = []
            for sp in range(S):
                pieces = []
                for j in range(H):
                    m = sp * H + j
                    pieces.append(heads[t][m // S][(m % S):(m % S) + 1, :])   # (1, d)
                rows.append(jnp.concatenate(pieces, axis=1))                  # (1, E)
            return jnp.concatenate(rows, axis=0)                              # (S, E)

        q, k, v = fold(0), fold(1), fold(2)

        # 4) scaled dot-product attention (valid_lens=None, dropout=identity).
        scores = jax.lax.dot_general(q, k, (((1,), (1,)), ((), ())),
                                     preferred_element_type=jnp.float32)   # (S, S)
        scores = scores - jnp.max(scores, axis=-1, keepdims=True)
        e = jnp.exp(scores)
        denom = jnp.sum(e, axis=-1, keepdims=True)
        r = pl.reciprocal(denom, approx=True)       # EUP slot
        r = r * (2.0 - denom * r)                   # one Newton step -> f32-accurate
        a = e * r                                   # attention weights (S, S)
        att = jnp.dot(a, v, preferred_element_type=jnp.float32)            # (S, E)

        # 5) src2 = norm1(att); X = AddNorm(src2, src) = LN(src + src2) (dropout = id).
        src2 = _layer_norm(att)
        X = _layer_norm(x + src2)

        # 6) single packed store of this batch's output block: [X | a] -> (S, E+S).
        out_ref[...] = jnp.concatenate([X, a], axis=1).astype(out_ref.dtype)

    return kernel


# --------------------------------- JAX wrapper -------------------------------- #

def transformer_position_layer(src, w_qkv, p, *, num_heads):
    """src: (B,S,E) f32; w_qkv: (E,3E) = [Wq/sqrt(E) | Wk | Wv]; p: (S,E) positional table."""
    B, S, E = src.shape
    assert E % num_heads == 0
    kernel = _make_kernel(S, E, num_heads)
    out = pl.pallas_call(
        kernel,
        out_shape=jax.ShapeDtypeStruct((B * S, E + S), src.dtype),
        grid=(B,),
        in_specs=[
            pl.BlockSpec((1, S, E), lambda b: (b, 0, 0)),      # per-batch activation tile
            pl.BlockSpec((S, E), lambda b: (0, 0)),            # pos table: VMEM-resident
            pl.BlockSpec((E, 3 * E), lambda b: (0, 0)),        # packed weights: VMEM-resident
        ],
        out_specs=pl.BlockSpec((S, E + S), lambda b: (b, 0)),  # packed [X | a] slab
        compiler_params=pltpu.CompilerParams(
            dimension_semantics=("parallel",)),                # shard batch across cores
    )(src, p, w_qkv)
    X = out[:, :E].reshape(B, S, E)
    a = out[:, E:].reshape(B, S, S)
    return X, a


# ------------------------------ one-time host prep ---------------------------- #

def positional_encoding_table(num_hiddens, max_len=1000):
    pos = jnp.arange(max_len, dtype=jnp.float32)[:, None]
    div = jnp.power(10000.0,
                    jnp.arange(0, num_hiddens, 2, dtype=jnp.float32) / num_hiddens)
    ang = pos / div                                             # (max_len, E//2)
    P = jnp.zeros((max_len, num_hiddens), jnp.float32)
    P = P.at[:, 0::2].set(jnp.sin(ang))
    P = P.at[:, 1::2].set(jnp.cos(ang))
    return P


def pack_qkv_weights(wq, wk, wv):
    """Fold the 1/sqrt(num_hiddens) score scale into Wq and pack [Wq|Wk|Wv] once on host."""
    scale = 1.0 / math.sqrt(wq.shape[1])
    return jnp.concatenate([wq * scale, wk, wv], axis=1)


# ------------------------------ pure-JAX reference ----------------------------- #

def _layer_norm_ref(x, eps=1e-5):
    mu = jnp.mean(x, axis=-1, keepdims=True)
    var = jnp.mean((x - mu) ** 2, axis=-1, keepdims=True)
    return (x - mu) * jax.lax.rsqrt(var + eps)


def _transpose_qkv_ref(X, num_heads):
    B, S, E = X.shape
    X = X.reshape(B, S, num_heads, E // num_heads)
    X = jnp.transpose(X, (0, 2, 1, 3))            # (B, H, S, d)
    return X.reshape(B, S, E)                     # module's row-major reinterpretation


def _reference(src, wq, wk, wv, p, num_heads):
    B, S, E = src.shape
    x = src + p[None, :, :]
    q = _transpose_qkv_ref(jnp.einsum("bse,ef->bsf", x, wq), num_heads)
    k = _transpose_qkv_ref(jnp.einsum("bse,ef->bsf", x, wk), num_heads)
    v = _transpose_qkv_ref(jnp.einsum("bse,ef->bsf", x, wv), num_heads)
    scores = jnp.einsum("bqe,bke->bqk", q, k) / math.sqrt(E)
    a = jax.nn.softmax(scores, axis=-1)
    att = jnp.einsum("bqk,bke->bqe", a, v)
    src2 = _layer_norm_ref(att)
    return _layer_norm_ref(x + src2), a


# ------------------------------------- main ------------------------------------ #

if __name__ == "__main__":
    B, S, E, H = 2, 8, 32, 4          # batch, seq, hidden_size, num_heads
    key = jax.random.PRNGKey(0)
    k_src, k_wq, k_wk, k_wv = jax.random.split(key, 4)

    src = jax.random.normal(k_src, (B, S, E), jnp.float32)
    bound = 1.0 / math.sqrt(E)        # deterministic synthetic init (torch-like scale)
    wq = jax.random.uniform(k_wq, (E, E), jnp.float32, -bound, bound)
    wk = jax.random.uniform(k_wk, (E, E), jnp.float32, -bound, bound)
    wv = jax.random.uniform(k_wv, (E, E), jnp.float32, -bound, bound)

    p = positional_encoding_table(E)[:S]          # (S, E)
    w_qkv = pack_qkv_weights(wq, wk, wv)          # (E, 3E), scale folded into Wq

    fwd = jax.jit(functools.partial(transformer_position_layer, num_heads=H))
    out, attn = jax.block_until_ready(fwd(src, w_qkv, p))

    ref_out, ref_attn = _reference(src, wq, wk, wv, p, H)
    assert out.shape == (B, S, E) and attn.shape == (B, S, S)
    assert jnp.allclose(out, ref_out, atol=1e-4, rtol=1e-4), \
        float(jnp.max(jnp.abs(out - ref_out)))
    assert jnp.allclose(attn, ref_attn, atol=1e-5, rtol=1e-4), \
        float(jnp.max(jnp.abs(attn - ref_attn)))

    print("KERNEL_OK")
</pallas_src>

<mosaic_0001>
module attributes {stable_mosaic.version = 11 : i64} {
  func.func @kernel(%arg0: i32, %arg1: memref<1x8x32xf32, #tpu.memory_space<vmem>>, %arg2: memref<8x32xf32, #tpu.memory_space<vmem>>, %arg3: memref<32x96xf32, #tpu.memory_space<vmem>>, %arg4: memref<8x40xf32, #tpu.memory_space<vmem>>) attributes {dimension_semantics = [#tpu.dimension_semantics<parallel>], iteration_bounds = array<i64: 2>, scalar_prefetch = 0 : i64, scratch_operands = 0 : i64, tpu.core_type = #tpu.core_type<tc>, window_params = [{transform_indices = @transform_0, window_bounds = array<i64: 1, 8, 32>}, {pipeline_mode = #tpu.pipeline_mode<synchronous>, transform_indices = @transform_1, window_bounds = array<i64: 8, 32>}, {pipeline_mode = #tpu.pipeline_mode<synchronous>, transform_indices = @transform_2, window_bounds = array<i64: 32, 96>}, {transform_indices = @transform_3, window_bounds = array<i64: 8, 40>}]} {
    %c0 = arith.constant 0 : index
    %c0_0 = arith.constant 0 : index
    %c0_1 = arith.constant 0 : index
    %0 = vector.load %arg1[%c0, %c0_0, %c0_1] : memref<1x8x32xf32, #tpu.memory_space<vmem>>, vector<1x8x32xf32>
    %1 = vector.shape_cast %0 : vector<1x8x32xf32> to vector<8x32xf32>
    %c0_2 = arith.constant 0 : index
    %c0_3 = arith.constant 0 : index
    %2 = vector.load %arg2[%c0_2, %c0_3] : memref<8x32xf32, #tpu.memory_space<vmem>>, vector<8x32xf32>
    %3 = arith.addf %1, %2 : vector<8x32xf32>
    %c0_4 = arith.constant 0 : index
    %c0_5 = arith.constant 0 : index
    %4 = vector.load %arg3[%c0_4, %c0_5] : memref<32x96xf32, #tpu.memory_space<vmem>>, vector<32x96xf32>
    %cst = arith.constant dense<0.000000e+00> : vector<8x96xf32>
    %5 = tpu.matmul %3, %4, %cst {dimension_numbers = #tpu.dot_dimension_numbers<[1], [0], [0], [1], [0, 0, 1, 1], [], []>} : vector<8x32xf32>, vector<32x96xf32>, vector<8x96xf32> -> vector<8x96xf32>
    %6 = vector.extract_strided_slice %5 {offsets = [0, 0], sizes = [8, 8], strides = [1, 1]} : vector<8x96xf32> to vector<8x8xf32>
    %7 = vector.extract_strided_slice %5 {offsets = [0, 8], sizes = [8, 8], strides = [1, 1]} : vector<8x96xf32> to vector<8x8xf32>
    %8 = vector.extract_strided_slice %5 {offsets = [0, 16], sizes = [8, 8], strides = [1, 1]} : vector<8x96xf32> to vector<8x8xf32>
    %9 = vector.extract_strided_slice %5 {offsets = [0, 24], sizes = [8, 8], strides = [1, 1]} : vector<8x96xf32> to vector<8x8xf32>
    %10 = vector.extract_strided_slice %5 {offsets = [0, 32], sizes = [8, 8], strides = [1, 1]} : vector<8x96xf32> to vector<8x8xf32>
    %11 = vector.extract_strided_slice %5 {offsets = [0, 40], sizes = [8, 8], strides = [1, 1]} : vector<8x96xf32> to vector<8x8xf32>
    %12 = vector.extract_strided_slice %5 {offsets = [0, 48], sizes = [8, 8], strides = [1, 1]} : vector<8x96xf32> to vector<8x8xf32>
    %13 = vector.extract_strided_slice %5 {offsets = [0, 56], sizes = [8, 8], strides = [1, 1]} : vector<8x96xf32> to vector<8x8xf32>
    %14 = vector.extract_strided_slice %5 {offsets = [0, 64], sizes = [8, 8], strides = [1, 1]} : vector<8x96xf32> to vector<8x8xf32>
    %15 = vector.extract_strided_slice %5 {offsets = [0, 72], sizes = [8, 8], strides = [1, 1]} : vector<8x96xf32> to vector<8x8xf32>
    %16 = vector.extract_strided_slice %5 {offsets = [0, 80], sizes = [8, 8], strides = [1, 1]} : vector<8x96xf32> to vector<8x8xf32>
    %17 = vector.extract_strided_slice %5 {offsets = [0, 88], sizes = [8, 8], strides = [1, 1]} : vector<8x96xf32> to vector<8x8xf32>
    %18 = vector.extract_strided_slice %6 {offsets = [0, 0], sizes = [1, 8], strides = [1, 1]} : vector<8x8xf32> to vector<1x8xf32>
    %19 = vector.extract_strided_slice %6 {offsets = [1, 0], sizes = [1, 8], strides = [1, 1]} : vector<8x8xf32> to vector<1x8xf32>
    %20 = vector.extract_strided_slice %6 {offsets = [2, 0], sizes = [1, 8], strides = [1, 1]} : vector<8x8xf32> to vector<1x8xf32>
    %21 = vector.extract_strided_slice %6 {offsets = [3, 0], sizes = [1, 8], strides = [1, 1]} : vector<8x8xf32> to vector<1x8xf32>
    %22 = tpu.concatenate %18, %19, %20, %21 in 1 : vector<1x8xf32>, vector<1x8xf32>, vector<1x8xf32>, vector<1x8xf32> -> vector<1x32xf32>
    %23 = vector.extract_strided_slice %6 {offsets = [4, 0], sizes = [1, 8], strides = [1, 1]} : vector<8x8xf32> to vector<1x8xf32>
    %24 = vector.extract_strided_slice %6 {offsets = [5, 0], sizes = [1, 8], strides = [1, 1]} : vector<8x8xf32> to vector<1x8xf32>
    %25 = vector.extract_strided_slice %6 {offsets = [6, 0], sizes = [1, 8], strides = [1, 1]} : vector<8x8xf32> to vector<1x8xf32>
    %26 = vector.extract_strided_slice %6 {offsets = [7, 0], sizes = [1, 8], strides = [1, 1]} : vector<8x8xf32> to vector<1x8xf32>
    %27 = tpu.concatenate %23, %24, %25, %26 in 1 : vector<1x8xf32>, vector<1x8xf32>, vector<1x8xf32>, vector<1x8xf32> -> vector<1x32xf32>
    %28 = vector.extract_strided_slice %7 {offsets = [0, 0], sizes = [1, 8], strides = [1, 1]} : vector<8x8xf32> to vector<1x8xf32>
    %29 = vector.extract_strided_slice %7 {offsets = [1, 0], sizes = [1, 8], strides = [1, 1]} : vector<8x8xf32> to vector<1x8xf32>
    %30 = vector.extract_strided_slice %7 {offsets = [2, 0], sizes = [1, 8], strides = [1, 1]} : vector<8x8xf32> to vector<1x8xf32>
    %31 = vector.extract_strided_slice %7 {offsets = [3, 0], sizes = [1, 8], strides = [1, 1]} : vector<8x8xf32> to vector<1x8xf32>
    %32 = tpu.concatenate %28, %29, %30, %31 in 1 : vector<1x8xf32>, vector<1x8xf32>, vector<1x8xf32>, vector<1x8xf32> -> vector<1x32xf32>
    %33 = vector.extract_strided_slice %7 {offsets = [4, 0], sizes = [1, 8], strides = [1, 1]} : vector<8x8xf32> to vector<1x8xf32>
    %34 = vector.extract_strided_slice %7 {offsets = [5, 0], sizes = [1, 8], strides = [1, 1]} : vector<8x8xf32> to vector<1x8xf32>
    %35 = vector.extract_strided_slice %7 {offsets = [6, 0], sizes = [1, 8], strides = [1, 1]} : vector<8x8xf32> to vector<1x8xf32>
    %36 = vector.extract_strided_slice %7 {offsets = [7, 0], sizes = [1, 8], strides = [1, 1]} : vector<8x8xf32> to vector<1x8xf32>
    %37 = tpu.concatenate %33, %34, %35, %36 in 1 : vector<1x8xf32>, vector<1x8xf32>, vector<1x8xf32>, vector<1x8xf32> -> vector<1x32xf32>
    %38 = vector.extract_strided_slice %8 {offsets = [0, 0], sizes = [1, 8], strides = [1, 1]} : vector<8x8xf32> to vector<1x8xf32>
    %39 = vector.extract_strided_slice %8 {offsets = [1, 0], sizes = [1, 8], strides = [1, 1]} : vector<8x8xf32> to vector<1x8xf32>
    %40 = vector.extract_strided_slice %8 {offsets = [2, 0], sizes = [1, 8], strides = [1, 1]} : vector<8x8xf32> to vector<1x8xf32>
    %41 = vector.extract_strided_slice %8 {offsets = [3, 0], sizes = [1, 8], strides = [1, 1]} : vector<8x8xf32> to vector<1x8xf32>
    %42 = tpu.concatenate %38, %39, %40, %41 in 1 : vector<1x8xf32>, vector<1x8xf32>, vector<1x8xf32>, vector<1x8xf32> -> vector<1x32xf32>
    %43 = vector.extract_strided_slice %8 {offsets = [4, 0], sizes = [1, 8], strides = [1, 1]} : vector<8x8xf32> to vector<1x8xf32>
    %44 = vector.extract_strided_slice %8 {offsets = [5, 0], sizes = [1, 8], strides = [1, 1]} : vector<8x8xf32> to vector<1x8xf32>
    %45 = vector.extract_strided_slice %8 {offsets = [6, 0], sizes = [1, 8], strides = [1, 1]} : vector<8x8xf32> to vector<1x8xf32>
    %46 = vector.extract_strided_slice %8 {offsets = [7, 0], sizes = [1, 8], strides = [1, 1]} : vector<8x8xf32> to vector<1x8xf32>
    %47 = tpu.concatenate %43, %44, %45, %46 in 1 : vector<1x8xf32>, vector<1x8xf32>, vector<1x8xf32>, vector<1x8xf32> -> vector<1x32xf32>
    %48 = vector.extract_strided_slice %9 {offsets = [0, 0], sizes = [1, 8], strides = [1, 1]} : vector<8x8xf32> to vector<1x8xf32>
    %49 = vector.extract_strided_slice %9 {offsets = [1, 0], sizes = [1, 8], strides = [1, 1]} : vector<8x8xf32> to vector<1x8xf32>
    %50 = vector.extract_strided_slice %9 {offsets = [2, 0], sizes = [1, 8], strides = [1, 1]} : vector<8x8xf32> to vector<1x8xf32>
    %51 = vector.extract_strided_slice %9 {offsets = [3, 0], sizes = [1, 8], strides = [1, 1]} : vector<8x8xf32> to vector<1x8xf32>
    %52 = tpu.concatenate %48, %49, %50, %51 in 1 : vector<1x8xf32>, vector<1x8xf32>, vector<1x8xf32>, vector<1x8xf32> -> vector<1x32xf32>
    %53 = vector.extract_strided_slice %9 {offsets = [4, 0], sizes = [1, 8], strides = [1, 1]} : vector<8x8xf32> to vector<1x8xf32>
    %54 = vector.extract_strided_slice %9 {offsets = [5, 0], sizes = [1, 8], strides = [1, 1]} : vector<8x8xf32> to vector<1x8xf32>
    %55 = vector.extract_strided_slice %9 {offsets = [6, 0], sizes = [1, 8], strides = [1, 1]} : vector<8x8xf32> to vector<1x8xf32>
    %56 = vector.extract_strided_slice %9 {offsets = [7, 0], sizes = [1, 8], strides = [1, 1]} : vector<8x8xf32> to vector<1x8xf32>
    %57 = tpu.concatenate %53, %54, %55, %56 in 1 : vector<1x8xf32>, vector<1x8xf32>, vector<1x8xf32>, vector<1x8xf32> -> vector<1x32xf32>
    %58 = tpu.concatenate %22, %27, %32, %37, %42, %47, %52, %57 in 0 : vector<1x32xf32>, vector<1x32xf32>, vector<1x32xf32>, vector<1x32xf32>, vector<1x32xf32>, vector<1x32xf32>, vector<1x32xf32>, vector<1x32xf32> -> vector<8x32xf32>
    %59 = vector.extract_strided_slice %10 {offsets = [0, 0], sizes = [1, 8], strides = [1, 1]} : vector<8x8xf32> to vector<1x8xf32>
    %60 = vector.extract_strided_slice %10 {offsets = [1, 0], sizes = [1, 8], strides = [1, 1]} : vector<8x8xf32> to vector<1x8xf32>
    %61 = vector.extract_strided_slice %10 {offsets = [2, 0], sizes = [1, 8], strides = [1, 1]} : vector<8x8xf32> to vector<1x8xf32>
    %62 = vector.extract_strided_slice %10 {offsets = [3, 0], sizes = [1, 8], strides = [1, 1]} : vector<8x8xf32> to vector<1x8xf32>
    %63 = tpu.concatenate %59, %60, %61, %62 in 1 : vector<1x8xf32>, vector<1x8xf32>, vector<1x8xf32>, vector<1x8xf32> -> vector<1x32xf32>
    %64 = vector.extract_strided_slice %10 {offsets = [4, 0], sizes = [1, 8], strides = [1, 1]} : vector<8x8xf32> to vector<1x8xf32>
    %65 = vector.extract_strided_slice %10 {offsets = [5, 0], sizes = [1, 8], strides = [1, 1]} : vector<8x8xf32> to vector<1x8xf32>
    %66 = vector.extract_strided_slice %10 {offsets = [6, 0], sizes = [1, 8], strides = [1, 1]} : vector<8x8xf32> to vector<1x8xf32>
    %67 = vector.extract_strided_slice %10 {offsets = [7, 0], sizes = [1, 8], strides = [1, 1]} : vector<8x8xf32> to vector<1x8xf32>
    %68 = tpu.concatenate %64, %65, %66, %67 in 1 : vector<1x8xf32>, vector<1x8xf32>, vector<1x8xf32>, vector<1x8xf32> -> vector<1x32xf32>
    %69 = vector.extract_strided_slice %11 {offsets = [0, 0], sizes = [1, 8], strides = [1, 1]} : vector<8x8xf32> to vector<1x8xf32>
    %70 = vector.extract_strided_slice %11 {offsets = [1, 0], sizes = [1, 8], strides = [1, 1]} : vector<8x8xf32> to vector<1x8xf32>
    %71 = vector.extract_strided_slice %11 {offsets = [2, 0], sizes = [1, 8], strides = [1, 1]} : vector<8x8xf32> to vector<1x8xf32>
    %72 = vector.extract_strided_slice %11 {offsets = [3, 0], sizes = [1, 8], strides = [1, 1]} : vector<8x8xf32> to vector<1x8xf32>
    %73 = tpu.concatenate %69, %70, %71, %72 in 1 : vector<1x8xf32>, vector<1x8xf32>, vector<1x8xf32>, vector<1x8xf32> -> vector<1x32xf32>
    %74 = vector.extract_strided_slice %11 {offsets = [4, 0], sizes = [1, 8], strides = [1, 1]} : vector<8x8xf32> to vector<1x8xf32>
    %75 = vector.extract_strided_slice %11 {offsets = [5, 0], sizes = [1, 8], strides = [1, 1]} : vector<8x8xf32> to vector<1x8xf32>
    %76 = vector.extract_strided_slice %11 {offsets = [6, 0], sizes = [1, 8], strides = [1, 1]} : vector<8x8xf32> to vector<1x8xf32>
    %77 = vector.extract_strided_slice %11 {offsets = [7, 0], sizes = [1, 8], strides = [1, 1]} : vector<8x8xf32> to vector<1x8xf32>
    %78 = tpu.concatenate %74, %75, %76, %77 in 1 : vector<1x8xf32>, vector<1x8xf32>, vector<1x8xf32>, vector<1x8xf32> -> vector<1x32xf32>
    %79 = vector.extract_strided_slice %12 {offsets = [0, 0], sizes = [1, 8], strides = [1, 1]} : vector<8x8xf32> to vector<1x8xf32>
    %80 = vector.extract_strided_slice %12 {offsets = [1, 0], sizes = [1, 8], strides = [1, 1]} : vector<8x8xf32> to vector<1x8xf32>
    %81 = vector.extract_strided_slice %12 {offsets = [2, 0], sizes = [1, 8], strides = [1, 1]} : vector<8x8xf32> to vector<1x8xf32>
    %82 = vector.extract_strided_slice %12 {offsets = [3, 0], sizes = [1, 8], strides = [1, 1]} : vector<8x8xf32> to vector<1x8xf32>
    %83 = tpu.concatenate %79, %80, %81, %82 in 1 : vector<1x8xf32>, vector<1x8xf32>, vector<1x8xf32>, vector<1x8xf32> -> vector<1x32xf32>
    %84 = vector.extract_strided_slice %12 {offsets = [4, 0], sizes = [1, 8], strides = [1, 1]} : vector<8x8xf32> to vector<1x8xf32>
    %85 = vector.extract_strided_slice %12 {offsets = [5, 0], sizes = [1, 8], strides = [1, 1]} : vector<8x8xf32> to vector<1x8xf32>
    %86 = vector.extract_strided_slice %12 {offsets = [6, 0], sizes = [1, 8], strides = [1, 1]} : vector<8x8xf32> to vector<1x8xf32>
    %87 = vector.extract_strided_slice %12 {offsets = [7, 0], sizes = [1, 8], strides = [1, 1]} : vector<8x8xf32> to vector<1x8xf32>
    %88 = tpu.concatenate %84, %85, %86, %87 in 1 : vector<1x8xf32>, vector<1x8xf32>, vector<1x8xf32>, vector<1x8xf32> -> vector<1x32xf32>
    %89 = vector.extract_strided_slice %13 {offsets = [0, 0], sizes = [1, 8], strides = [1, 1]} : vector<8x8xf32> to vector<1x8xf32>
    %90 = vector.extract_strided_slice %13 {offsets = [1, 0], sizes = [1, 8], strides = [1, 1]} : vector<8x8xf32> to vector<1x8xf32>
    %91 = vector.extract_strided_slice %13 {offsets = [2, 0], sizes = [1, 8], strides = [1, 1]} : vector<8x8xf32> to vector<1x8xf32>
    %92 = vector.extract_strided_slice %13 {offsets = [3, 0], sizes = [1, 8], strides = [1, 1]} : vector<8x8xf32> to vector<1x8xf32>
    %93 = tpu.concatenate %89, %90, %91, %92 in 1 : vector<1x8xf32>, vector<1x8xf32>, vector<1x8xf32>, vector<1x8xf32> -> vector<1x32xf32>
    %94 = vector.extract_strided_slice %13 {offsets = [4, 0], sizes = [1, 8], strides = [1, 1]} : vector<8x8xf32> to vector<1x8xf32>
    %95 = vector.extract_strided_slice %13 {offsets = [5, 0], sizes = [1, 8], strides = [1, 1]} : vector<8x8xf32> to vector<1x8xf32>
    %96 = vector.extract_strided_slice %13 {offsets = [6, 0], sizes = [1, 8], strides = [1, 1]} : vector<8x8xf32> to vector<1x8xf32>
    %97 = vector.extract_strided_slice %13 {offsets = [7, 0], sizes = [1, 8], strides = [1, 1]} : vector<8x8xf32> to vector<1x8xf32>
    %98 = tpu.concatenate %94, %95, %96, %97 in 1 : vector<1x8xf32>, vector<1x8xf32>, vector<1x8xf32>, vector<1x8xf32> -> vector<1x32xf32>
    %99 = tpu.concatenate %63, %68, %73, %78, %83, %88, %93, %98 in 0 : vector<1x32xf32>, vector<1x32xf32>, vector<1x32xf32>, vector<1x32xf32>, vector<1x32xf32>, vector<1x32xf32>, vector<1x32xf32>, vector<1x32xf32> -> vector<8x32xf32>
    %100 = vector.extract_strided_slice %14 {offsets = [0, 0], sizes = [1, 8], strides = [1, 1]} : vector<8x8xf32> to vector<1x8xf32>
    %101 = vector.extract_strided_slice %14 {offsets = [1, 0], sizes = [1, 8], strides = [1, 1]} : vector<8x8xf32> to vector<1x8xf32>
    %102 = vector.extract_strided_slice %14 {offsets = [2, 0], sizes = [1, 8], strides = [1, 1]} : vector<8x8xf32> to vector<1x8xf32>
    %103 = vector.extract_strided_slice %14 {offsets = [3, 0], sizes = [1, 8], strides = [1, 1]} : vector<8x8xf32> to vector<1x8xf32>
    %104 = tpu.concatenate %100, %101, %102, %103 in 1 : vector<1x8xf32>, vector<1x8xf32>, vector<1x8xf32>, vector<1x8xf32> -> vector<1x32xf32>
    %105 = vector.extract_strided_slice %14 {offsets = [4, 0], sizes = [1, 8], strides = [1, 1]} : vector<8x8xf32> to vector<1x8xf32>
    %106 = vector.extract_strided_slice %14 {offsets = [5, 0], sizes = [1, 8], strides = [1, 1]} : vector<8x8xf32> to vector<1x8xf32>
    %107 = vector.extract_strided_slice %14 {offsets = [6, 0], sizes = [1, 8], strides = [1, 1]} : vector<8x8xf32> to vector<1x8xf32>
    %108 = vector.extract_strided_slice %14 {offsets = [7, 0], sizes = [1, 8], strides = [1, 1]} : vector<8x8xf32> to vector<1x8xf32>
    %109 = tpu.concatenate %105, %106, %107, %108 in 1 : vector<1x8xf32>, vector<1x8xf32>, vector<1x8xf32>, vector<1x8xf32> -> vector<1x32xf32>
    %110 = vector.extract_strided_slice %15 {offsets = [0, 0], sizes = [1, 8], strides = [1, 1]} : vector<8x8xf32> to vector<1x8xf32>
    %111 = vector.extract_strided_slice %15 {offsets = [1, 0], sizes = [1, 8], strides = [1, 1]} : vector<8x8xf32> to vector<1x8xf32>
    %112 = vector.extract_strided_slice %15 {offsets = [2, 0], sizes = [1, 8], strides = [1, 1]} : vector<8x8xf32> to vector<1x8xf32>
    %113 = vector.extract_strided_slice %15 {offsets = [3, 0], sizes = [1, 8], strides = [1, 1]} : vector<8x8xf32> to vector<1x8xf32>
    %114 = tpu.concatenate %110, %111, %112, %113 in 1 : vector<1x8xf32>, vector<1x8xf32>, vector<1x8xf32>, vector<1x8xf32> -> vector<1x32xf32>
    %115 = vector.extract_strided_slice %15 {offsets = [4, 0], sizes = [1, 8], strides = [1, 1]} : vector<8x8xf32> to vector<1x8xf32>
    %116 = vector.extract_strided_slice %15 {offsets = [5, 0], sizes = [1, 8], strides = [1, 1]} : vector<8x8xf32> to vector<1x8xf32>
    %117 = vector.extract_strided_slice %15 {offsets = [6, 0], sizes = [1, 8], strides = [1, 1]} : vector<8x8xf32> to vector<1x8xf32>
    %118 = vector.extract_strided_slice %15 {offsets = [7, 0], sizes = [1, 8], strides = [1, 1]} : vector<8x8xf32> to vector<1x8xf32>
    %119 = tpu.concatenate %115, %116, %117, %118 in 1 : vector<1x8xf32>, vector<1x8xf32>, vector<1x8xf32>, vector<1x8xf32> -> vector<1x32xf32>
    %120 = vector.extract_strided_slice %16 {offsets = [0, 0], sizes = [1, 8], strides = [1, 1]} : vector<8x8xf32> to vector<1x8xf32>
    %121 = vector.extract_strided_slice %16 {offsets = [1, 0], sizes = [1, 8], strides = [1, 1]} : vector<8x8xf32> to vector<1x8xf32>
    %122 = vector.extract_strided_slice %16 {offsets = [2, 0], sizes = [1, 8], strides = [1, 1]} : vector<8x8xf32> to vector<1x8xf32>
    %123 = vector.extract_strided_slice %16 {offsets = [3, 0], sizes = [1, 8], strides = [1, 1]} : vector<8x8xf32> to vector<1x8xf32>
    %124 = tpu.concatenate %120, %121, %122, %123 in 1 : vector<1x8xf32>, vector<1x8xf32>, vector<1x8xf32>, vector<1x8xf32> -> vector<1x32xf32>
    %125 = vector.extract_strided_slice %16 {offsets = [4, 0], sizes = [1, 8], strides = [1, 1]} : vector<8x8xf32> to vector<1x8xf32>
    %126 = vector.extract_strided_slice %16 {offsets = [5, 0], sizes = [1, 8], strides = [1, 1]} : vector<8x8xf32> to vector<1x8xf32>
    %127 = vector.extract_strided_slice %16 {offsets = [6, 0], sizes = [1, 8], strides = [1, 1]} : vector<8x8xf32> to vector<1x8xf32>
    %128 = vector.extract_strided_slice %16 {offsets = [7, 0], sizes = [1, 8], strides = [1, 1]} : vector<8x8xf32> to vector<1x8xf32>
    %129 = tpu.concatenate %125, %126, %127, %128 in 1 : vector<1x8xf32>, vector<1x8xf32>, vector<1x8xf32>, vector<1x8xf32> -> vector<1x32xf32>
    %130 = vector.extract_strided_slice %17 {offsets = [0, 0], sizes = [1, 8], strides = [1, 1]} : vector<8x8xf32> to vector<1x8xf32>
    %131 = vector.extract_strided_slice %17 {offsets = [1, 0], sizes = [1, 8], strides = [1, 1]} : vector<8x8xf32> to vector<1x8xf32>
    %132 = vector.extract_strided_slice %17 {offsets = [2, 0], sizes = [1, 8], strides = [1, 1]} : vector<8x8xf32> to vector<1x8xf32>
    %133 = vector.extract_strided_slice %17 {offsets = [3, 0], sizes = [1, 8], strides = [1, 1]} : vector<8x8xf32> to vector<1x8xf32>
    %134 = tpu.concatenate %130, %131, %132, %133 in 1 : vector<1x8xf32>, vector<1x8xf32>, vector<1x8xf32>, vector<1x8xf32> -> vector<1x32xf32>
    %135 = vector.extract_strided_slice %17 {offsets = [4, 0], sizes = [1, 8], strides = [1, 1]} : vector<8x8xf32> to vector<1x8xf32>
    %136 = vector.extract_strided_slice %17 {offsets = [5, 0], sizes = [1, 8], strides = [1, 1]} : vector<8x8xf32> to vector<1x8xf32>
    %137 = vector.extract_strided_slice %17 {offsets = [6, 0], sizes = [1, 8], strides = [1, 1]} : vector<8x8xf32> to vector<1x8xf32>
    %138 = vector.extract_strided_slice %17 {offsets = [7, 0], sizes = [1, 8], strides = [1, 1]} : vector<8x8xf32> to vector<1x8xf32>
    %139 = tpu.concatenate %135, %136, %137, %138 in 1 : vector<1x8xf32>, vector<1x8xf32>, vector<1x8xf32>, vector<1x8xf32> -> vector<1x32xf32>
    %140 = tpu.concatenate %104, %109, %114, %119, %124, %129, %134, %139 in 0 : vector<1x32xf32>, vector<1x32xf32>, vector<1x32xf32>, vector<1x32xf32>, vector<1x32xf32>, vector<1x32xf32>, vector<1x32xf32>, vector<1x32xf32> -> vector<8x32xf32>
    %cst_6 = arith.constant dense<0.000000e+00> : vector<8x8xf32>
    %141 = tpu.matmul %58, %99, %cst_6 {dimension_numbers = #tpu.dot_dimension_numbers<[1], [1], [0], [0], [0, 0, 1, 0], [], []>} : vector<8x32xf32>, vector<8x32xf32>, vector<8x8xf32> -> vector<8x8xf32>
    %cst_7 = arith.constant dense<0xFF800000> : vector<8xf32>
    %142 = vector.multi_reduction <maximumf>, %141, %cst_7 [1] : vector<8x8xf32> to vector<8xf32>
    %143 = vector.shape_cast %142 : vector<8xf32> to vector<8x1xf32>
    %144 = vector.broadcast %143 : vector<8x1xf32> to vector<8x8xf32>
    %145 = arith.subf %141, %144 : vector<8x8xf32>
    %146 = math.exp %145 : vector<8x8xf32>
    %cst_8 = arith.constant dense<0.000000e+00> : vector<8xf32>
    %147 = vector.multi_reduction <add>, %146, %cst_8 [1] : vector<8x8xf32> to vector<8xf32>
    %148 = vector.shape_cast %147 : vector<8xf32> to vector<8x1xf32>
    %149 = tpu.reciprocal %148 {approx = true} : vector<8x1xf32> -> vector<8x1xf32>
    %150 = arith.mulf %148, %149 : vector<8x1xf32>
    %cst_9 = arith.constant 2.000000e+00 : f32
    %151 = vector.broadcast %cst_9 : f32 to vector<8x1xf32>
    %152 = arith.subf %151, %150 : vector<8x1xf32>
    %153 = arith.mulf %149, %152 : vector<8x1xf32>
    %154 = vector.broadcast %153 : vector<8x1xf32> to vector<8x8xf32>
    %155 = arith.mulf %146, %154 : vector<8x8xf32>
    %cst_10 = arith.constant dense<0.000000e+00> : vector<8x32xf32>
    %156 = tpu.matmul %155, %140, %cst_10 {dimension_numbers = #tpu.dot_dimension_numbers<[1], [0], [0], [1], [0, 0, 1, 1], [], []>} : vector<8x8xf32>, vector<8x32xf32>, vector<8x32xf32> -> vector<8x32xf32>
    %cst_11 = arith.constant dense<0.000000e+00> : vector<8xf32>
    %157 = vector.multi_reduction <add>, %156, %cst_11 [1] : vector<8x32xf32> to vector<8xf32>
    %158 = vector.shape_cast %157 : vector<8xf32> to vector<8x1xf32>
    %cst_12 = arith.constant 3.200000e+01 : f32
    %159 = vector.broadcast %cst_12 : f32 to vector<8x1xf32>
    %160 = arith.divf %158, %159 : vector<8x1xf32>
    %161 = arith.mulf %156, %156 : vector<8x32xf32>
    %cst_13 = arith.constant dense<0.000000e+00> : vector<8xf32>
    %162 = vector.multi_reduction <add>, %161, %cst_13 [1] : vector<8x32xf32> to vector<8xf32>
    %163 = vector.shape_cast %162 : vector<8xf32> to vector<8x1xf32>
    %cst_14 = arith.constant 3.200000e+01 : f32
    %164 = vector.broadcast %cst_14 : f32 to vector<8x1xf32>
    %165 = arith.divf %163, %164 : vector<8x1xf32>
    %166 = arith.mulf %160, %160 : vector<8x1xf32>
    %167 = arith.subf %165, %166 : vector<8x1xf32>
    %168 = vector.broadcast %160 : vector<8x1xf32> to vector<8x32xf32>
    %169 = arith.subf %156, %168 : vector<8x32xf32>
    %cst_15 = arith.constant 9.99999974E-6 : f32
    %170 = vector.broadcast %cst_15 : f32 to vector<8x1xf32>
    %171 = arith.addf %167, %170 : vector<8x1xf32>
    %172 = math.rsqrt %171 : vector<8x1xf32>
    %173 = vector.broadcast %172 : vector<8x1xf32> to vector<8x32xf32>
    %174 = arith.mulf %169, %173 : vector<8x32xf32>
    %175 = arith.addf %3, %174 : vector<8x32xf32>
    %cst_16 = arith.constant dense<0.000000e+00> : vector<8xf32>
    %176 = vector.multi_reduction <add>, %175, %cst_16 [1] : vector<8x32xf32> to vector<8xf32>
    %177 = vector.shape_cast %176 : vector<8xf32> to vector<8x1xf32>
    %cst_17 = arith.constant 3.200000e+01 : f32
    %178 = vector.broadcast %cst_17 : f32 to vector<8x1xf32>
    %179 = arith.divf %177, %178 : vector<8x1xf32>
    %180 = arith.mulf %175, %175 : vector<8x32xf32>
    %cst_18 = arith.constant dense<0.000000e+00> : vector<8xf32>
    %181 = vector.multi_reduction <add>, %180, %cst_18 [1] : vector<8x32xf32> to vector<8xf32>
    %182 = vector.shape_cast %181 : vector<8xf32> to vector<8x1xf32>
    %cst_19 = arith.constant 3.200000e+01 : f32
    %183 = vector.broadcast %cst_19 : f32 to vector<8x1xf32>
    %184 = arith.divf %182, %183 : vector<8x1xf32>
    %185 = arith.mulf %179, %179 : vector<8x1xf32>
    %186 = arith.subf %184, %185 : vector<8x1xf32>
    %187 = vector.broadcast %179 : vector<8x1xf32> to vector<8x32xf32>
    %188 = arith.subf %175, %187 : vector<8x32xf32>
    %cst_20 = arith.constant 9.99999974E-6 : f32
    %189 = vector.broadcast %cst_20 : f32 to vector<8x1xf32>
    %190 = arith.addf %186, %189 : vector<8x1xf32>
    %191 = math.rsqrt %190 : vector<8x1xf32>
    %192 = vector.broadcast %191 : vector<8x1xf32> to vector<8x32xf32>
    %193 = arith.mulf %188, %192 : vector<8x32xf32>
    %194 = tpu.concatenate %193, %155 in 1 : vector<8x32xf32>, vector<8x8xf32> -> vector<8x40xf32>
    %c0_21 = arith.constant 0 : index
    %c0_22 = arith.constant 0 : index
    %195 = vector.load %arg4[%c0_21, %c0_22] : memref<8x40xf32, #tpu.memory_space<vmem>>, vector<8x40xf32>
    tpu.vector_store %arg4[%c0_21, %c0_22], %194 {strides = array<i32>} : memref<8x40xf32, #tpu.memory_space<vmem>>, vector<8x40xf32>,
    return
  }
  func.func @transform_0(%arg0: i32) -> (i32, i32, i32) {
    %c0_i32 = arith.constant 0 : i32
    %c0_i32_0 = arith.constant 0 : i32
    %c0_i32_1 = arith.constant 0 : i32
    return %arg0, %c0_i32, %c0_i32_0 : i32, i32, i32
  }
  func.func @transform_1(%arg0: i32) -> (i32, i32) {
    %c0_i32 = arith.constant 0 : i32
    %c0_i32_0 = arith.constant 0 : i32
    %c0_i32_1 = arith.constant 0 : i32
    return %c0_i32, %c0_i32_0 : i32, i32
  }
  func.func @transform_2(%arg0: i32) -> (i32, i32) {
    %c0_i32 = arith.constant 0 : i32
    %c0_i32_0 = arith.constant 0 : i32
    %c0_i32_1 = arith.constant 0 : i32
    return %c0_i32, %c0_i32_0 : i32, i32
  }
  func.func @transform_3(%arg0: i32) -> (i32, i32) {
    %c0_i32 = arith.constant 0 : i32
    %c0_i32_0 = arith.constant 0 : i32
    return %arg0, %c0_i32 : i32, i32
  }
}

</mosaic_0001>

<bundles_post_ra>
// kernel: transformer_position_layer.1
= control target key start
LH: loop header
LB: loop body
LE: loop exit
PB: predicated region body
PF: predicated region fallthrough
CT: control target
= control target key end

     0   :  { %8 = vsyncpa [#allocation3], 0  ;;  %s1439_s0 = inlined_call_operand.hbm [shape: f32[2,8,32], index: 0, kind: input, shape index: {}]   ;;  %s1440_s1 = inlined_call_operand.hbm [shape: f32[8,32], index: 1, kind: input, shape index: {}]   ;;  %s1441_s2 = inlined_call_operand.hbm [shape: f32[32,96], index: 2, kind: input, shape index: {}]   ;;  %s1442_s3 = inlined_call_operand.vmem [shape: f32[16,40], index: 3, kind: output, shape index: {}]  }
   0x1   :  { %10 = vsyncpa [#allocation3 + $0x1], 0 }
   0x2   :  { %11 = vsyncpa [#allocation5], 0  ;;  %s1136_s12 = smov 0   ;;  %s1138_s13 = smov 0  }
   0x3   :  { %s1140_s14 = smov 0   ;;  %s1142_s15 = smov 0  }
   0x4 LB: > { %s1155_s16 = sadd.s32 4294967295, %s1092_s15   ;;  %p37_p0 = scmp.ne.s32.totalorder %s1084_s13, %s1080_s12  ;;  %s1092_s15 = sphi %s1142_s15, %s1457_s15   ;;  %s1088_s14 = sphi %s1140_s14, %s1456_s14   ;;  %s1084_s13 = sphi %s1138_s13, %s1455_s13   ;;  %s1080_s12 = sphi %s1136_s12, %s1454_s12  }
   0x5   : > { %p1443_p1 = scmp.eq.s32.totalorder %s1155_s16, 0  ;;  %p840_p2 = scmp.ge.s32.totalorder %s1092_s15, 1 }
   0x6   : > { %p116_p3 = scmp.lt.s32.totalorder %s1092_s15, 3  ;;  %s1094_s19 = smov [#allocation4]  }
   0x7   : > { %p1163_p4 = por %p1443_p1, %p37_p0  ;;  %s129_s20 = sshll.u32 %s1094_s19, 4  ;;  %s130_s20 = int_to_ptr.vmem [resolvable:$true] %s129_s20 }
   0x8   : > { %p1167_p5 = pnand %p840_p2, %p116_p3  ;;  %s1095_s21 = smov [#allocation6]  }
   0x9   : > { %s1446_s17 = scalar_select %p1163_p4, 1, 0 }
   0xa   : > { %s1447_s18 = scalar_select %p1167_p5, 1, 0 }
   0xb   : > { %p897_p6 = pneg %p1167_p5  ;;  %s139_s22 = sshll.u32 %s1095_s21, 4  ;;  %s140_s22 = int_to_ptr.vmem [resolvable:$true] %s139_s22 }
   0xc   : > { %s985_s24 = scalar_lea.vmem %s130_s20, 128  ;;  %p993_p12 = scmp.lt.s32.totalorder %s130_s20, %s130_s20 }
   0xd   : > { %p1175_p7 = pnand %p897_p6, %p1443_p1  ;;  %p986_p9 = scmp.ne.s32.totalorder %s130_s20, %s985_s24 }
   0xe   : > { %p994_p13 = scmp.lt.s32.totalorder %s985_s24, %s985_s24 }
   0xf   : > { %p976_p8 = pneg %p1175_p7 }
  0x10   : > { %p995_p0 = por %p994_p13, %p993_p12 }
  0x11   : > { %p988_p10 = pnand %p986_p9, %p976_p8 }
  0x13   : > { %p989_p11 = pneg %p988_p10 }
  0x15   : > { %p996_p2 = pnand %p995_p0, %p989_p11 }
  0x17   : > { %999 = shalt.err (!%p996_p2)
}
  0x18   : > { %900 = dma.hbm_to_vmem [thread:$0]  (!%p1175_p7), %s1440_s1, 128, %s130_s20, [#allocation5]  }
  0x19   : > { %s1011_s27 = scalar_lea.vmem %s140_s22, 512  ;;  %p1019_p9 = scmp.lt.s32.totalorder %s140_s22, %s140_s22 }
  0x1a   : > { %p1012_p3 = scmp.ne.s32.totalorder %s140_s22, %s1011_s27  ;;  %p1020_p10 = scmp.lt.s32.totalorder %s1011_s27, %s1011_s27 }
  0x1c   : > { %p1014_p6 = pnand %p1012_p3, %p976_p8  ;;  %p1021_p4 = por %p1020_p10, %p1019_p9 }
  0x1e   : > { %p1015_p1 = pneg %p1014_p6 }
  0x20   : > { %p1022_p5 = pnand %p1021_p4, %p1015_p1 }
  0x22   : > { %1025 = shalt.err (!%p1022_p5)
}
  0x23   : > { %s1096_s28 = smov 128   ;;  %s1097_s29 = smov 8  }
  0x24   : > { %903 = dma.hbm_to_vmem [thread:$0]  (!%p1175_p7), %s1441_s2, 512, %s140_s22, [#allocation5], %s1096_s28, %s1096_s28, %s1097_s29  }
  0x25   : > { %s1198_s5 = sadd.s32 1, %s1092_s15   ;;  %s24_s6 = sadd.s32 1, %s1088_s14 }
  0x26   : > { %s21_s7 = ssub.s32 %s1092_s15, %s1198_s5  ;;  %p31_p1 = scmp.ne.s32.totalorder %s1088_s14, %s1084_s13 }
  0x27   : > { %p22_p4 = scmp.eq.s32.totalorder %s21_s7, 0  ;;  %p32_p5 = scmp.eq.s32.totalorder %s1092_s15, 0 }
  0x28   : > { %p910_p8 = scmp.lt.s32.totalorder %s1092_s15, 2  ;;  %s153_s8 = sand.u32 1, %s1088_s14  }
  0x29   : > { %s1209_s9 = scalar_select %p22_p4, %s1088_s14, %s24_s6  }
  0x2a   : > { %p33_p11 = por %p32_p5, %p31_p1  ;;  %s844_s10 = sshll.u32 %s153_s8, 3 }
  0x2b   : > { %s845_s11 = sshll.u32 %s1092_s15, 7  ;;  %s157_s21 = scalar_lea.vmem [#allocation2], %s844_s10 }
  0x2c   : > { %s1215_s20 = scalar_lea.hbm %s1439_s0, %s845_s11  ;;  %s164_s22 = sshll.u32 %s157_s21, 4  ;;  %s165_s22 = int_to_ptr.vmem [resolvable:$true] %s164_s22 }
  0x2d   : > { %p1217_p7 = pnand %p910_p8, %p33_p11  ;;  %s154_s24 = scalar_lea.sflag [#allocation3], %s153_s8 }
  0x2e   : > { %s1026_s25 = scalar_lea.hbm %s1215_s20, 128  ;;  %s1031_s27 = scalar_lea.hbm %s1439_s0, 256 }
  0x2f   : > { %p1027_p12 = scmp.ne.s32.totalorder %s1215_s20, %s1026_s25  ;;  %p1028_p13 = pneg %p1217_p7 }
  0x30   : > { %p1032_p3 = scmp.lt.s32.totalorder %s1215_s20, %s1439_s0  ;;  %p1033_p6 = scmp.lt.s32.totalorder %s1031_s27, %s1026_s25 }
  0x31   : > { %p1029_p0 = pnand %p1028_p13, %p1027_p12 }
  0x32   : > { %p1034_p9 = por %p1033_p6, %p1032_p3 }
  0x33   : > { %p1030_p2 = pneg %p1029_p0 }
  0x35   : > { %p1035_p10 = pnand %p1034_p9, %p1030_p2 }
  0x37   : > { %1038 = shalt.err (!%p1035_p10)
}
  0x38   : > { %s1039_s30 = scalar_lea.vmem %s165_s22, 128  ;;  %s1098_s4 = smov [#allocation2]  }
  0x39   : > { %p1040_p1 = scmp.ne.s32.totalorder %s165_s22, %s1039_s30  ;;  %s1044_s6 = sshll.u32 %s1098_s4, 4  ;;  %s1045_s6 = int_to_ptr.vmem [resolvable:$false] %s1044_s6 }
  0x3a   : > { %s1046_s7 = scalar_lea.vmem %s1045_s6, 256  ;;  %p1047_p8 = scmp.lt.s32.totalorder %s165_s22, %s1045_s6 }
  0x3b   : > { %p1042_p4 = pnand %p1040_p1, %p1028_p13  ;;  %p1048_p11 = scmp.lt.s32.totalorder %s1046_s7, %s1039_s30 }
  0x3d   : > { %p1043_p5 = pneg %p1042_p4  ;;  %p1049_p12 = por %p1048_p11, %p1047_p8 }
  0x3f   : > { %p1050_p0 = pnand %p1049_p12, %p1043_p5 }
  0x41   : > { %1053 = shalt.err (!%p1050_p0)
}
  0x42   : > { %907 = dma.hbm_to_vmem [thread:$0]  (!%p1217_p7), %s1215_s20, 128, %s165_s22, %s154_s24  }
  0x43   : > { %p1450_p2 = scmp.ne.s32.totalorder %s1447_s18, 0 }
  0x44   : > { %s175_s8 = sand.u32 (!%p1450_p2), 1, %s1084_s13   ;;  %p1451_p13 = scmp.ne.s32.totalorder (!%p1450_p2), %s1446_s17, 0 }
  0x45   : > { %173 = sbr.rel (%p1450_p2) target bundleno = 1491 (0x5d3), region = 32  ;;  %s847_s10 = sshll.u32 (!%p1450_p2), %s175_s8, 3 }
  0x46   : > { %s176_s11 = scalar_lea.sflag (!%p1450_p2), [#allocation3], %s175_s8  ;;  %s179_s12 = scalar_lea.vmem (!%p1450_p2), [#allocation2], %s847_s10 }
  0x4a   : > { %1071 = dma.done.wait (%p1451_p13), %s176_s11, 128  }
  0x4b   : > { %1073 = vsyncadd (%p1451_p13), %s176_s11, 4294967168  ;;  %p1452_p3 = scmp.eq.s32.totalorder %s1155_s16, 0 }
  0x4d   : > { %1075 = dma.done.wait (%p1452_p3), [#allocation5], 640   ;;  %p1453_p6 = pmov %p1452_p3 }
  0x4e   : > { %v1099_v0 = vmov 0.0   ;;  %vm1100_vm0 = vmmov 0   ;;  %v219_v1 = vld [vmem:[#allocation6 + $0x18] sm:$0xff]  ;;  %v218_v2 = vld [vmem:[#allocation6 + $0x10] sm:$0xff]  ;;  %v217_v5 = vld [vmem:[#allocation6 + $0x8] sm:$0xff]  ;;  %vm220_vm1 = vcmask 261120  }
  0x4f   : > { %1077 = vsyncadd (%p1453_p6), [#allocation5], 4294966656  ;;  %866 = vmatprep.subr.mxu0 %v1099_v0  ;;  %874 = vmatprep.mubr.msk.f32.mxu0 %vm1100_vm0, %v1099_v0  ;;  %v213_v3 = vld [vmem:[%s179_s12] sm:$0xff]  ;;  %v214_v4 = vld [vmem:[#allocation4] sm:$0xff]  ;;  %s1101_s17 = smov 88   ;;  %s1102_s18 = smov 96  }
  0x50   : > { %877 = vmatprep.subr.mxu1 %v1099_v0  ;;  %879 = vmatprep.mubr.msk.f32.mxu1 %vm1100_vm0, %v1099_v0  ;;  %v216_v6 = vld [vmem:[#allocation6] sm:$0xff]  ;;  %v1254_v7 = vadd.f32 %v214_v4, %v213_v3  ;;  %s1103_s19 = smov 80   ;;  %s1104_s20 = smov 120   ;;  %vm309_vm2 = vcmask 130048   ;;  %vm307_vm3 = vcmask 64512   ;;  %vm311_vm4 = vcmask 195584  }
  0x51   : > { %867 = vmatpush3.msra.mxu0 %v219_v1  ;;  %s1105_s21 = smov 72   ;;  %s1106_s22 = smov 112   ;;  %vm370_vm5 = vcmask 1040384   ;;  %vm372_vm6 = vcmask 1041408   ;;  %vm374_vm7 = vcmask 1042432   ;;  %vm376_vm8 = vcmask 1043456  }
  0x52   : > { %868 = vmatprep.subr.mxu0 %v1099_v0  ;;  %s1107_s23 = smov 104   ;;  %s1108_s24 = smov 8   ;;  %vm378_vm9 = vcmask 1044480   ;;  %vm380_vm10 = vcmask 1045504   ;;  %vm382_vm11 = vcmask 1046528   ;;  %vm753_vm12 = vcmask 326656  }
  0x53   : > { %869 = vmatpush3.msra.mxu0 %v218_v2  ;;  %s1109_s25 = smov 16   ;;  %s1110_s15 = smov 24  }
  0x54   : > { %870 = vmatprep.subr.mxu0 %v1099_v0  ;;  %s1111_s26 = smov 56   ;;  %s1112_s27 = smov 48  }
  0x55   : > { %871 = vmatpush3.msra.mxu0 %v217_v5  ;;  %s1113_s28 = smov 64   ;;  %s1114_s29 = smov 40  }
  0x56   : > { %872 = vmatprep.subr.mxu0 %v1099_v0  ;;  %s1115_s30 = smov 32   ;;  %p209_p7 = scmp.lt.s32.totalorder %s1155_s16, 1 }
  0x57   : > { %873 = vmatpush3.msra.mxu0 %v216_v6 }
  0x58   : > { %875 = vmatmul.mubr.msk.f32.vlgmr.msra.gmra.mxu0 %vm220_vm1, %v1254_v7  ;;  %s1459_s16 = smov (!%p209_p7, %s1155_s16), 1 }
  0x59   : > { %s850_s4 = sshll.u32 %s1459_s16, 3 }
  0x5a   : > { %s212_s8 = scalar_lea.vmem %s1442_s3, %s850_s4 }
 0x118   : > { %v1259_v8 = vpop.f32.mrf.mxu0 }
 0x119   : > { %399 = vrot.lane.b32.xlu1 %v1259_v8, %s1101_s17  ;;  %384 = vrot.lane.b32.xlu0 %v1259_v8, %s1102_s18  ;;  %v1274_v10 = vrot.slane %v1259_v8, 1  ;;  %v1279_v11 = vrot.slane %v1259_v8, 2  ;;  %v1286_v12 = vrot.slane %v1259_v8, 3 }
 0x11a   : > { %v876_v9 = vpop.f32.mrf.mxu0 }
 0x11d   : > { %414 = vrot.lane.b32.xlu1 %v1259_v8, %s1103_s19  ;;  %313 = vrot.lane.b32.xlu0 %v1259_v8, %s1104_s20 }
 0x121   : > { %429 = vrot.lane.b32.xlu1 %v1259_v8, %s1105_s21  ;;  %326 = vrot.lane.b32.xlu0 %v1259_v8, %s1106_s22 }
 0x125   : > { %339 = vrot.lane.b32.xlu1 %v1259_v8, %s1107_s23  ;;  %387 = vrot.lane.b32.xlu0 %v1274_v10, %s1107_s23 }
 0x129   : > { %390 = vrot.lane.b32.xlu1 %v1279_v11, %s1106_s22  ;;  %402 = vrot.lane.b32.xlu0 %v1274_v10, %s1102_s18 }
 0x12d   : > { %393 = vrot.lane.b32.xlu1 %v1286_v12, %s1104_s20  ;;  %405 = vrot.lane.b32.xlu0 %v1279_v11, %s1107_s23 }
 0x131   : > { %296 = vrot.lane.b32.xlu1 %v1274_v10, %s1108_s24  ;;  %408 = vrot.lane.b32.xlu0 %v1286_v12, %s1106_s22 }
 0x135   : > { %300 = vrot.lane.b32.xlu1 %v1279_v11, %s1109_s25  ;;  %417 = vrot.lane.b32.xlu0 %v1274_v10, %s1101_s17 }
 0x139   : > { %420 = vrot.lane.b32.xlu1 %v1279_v11, %s1102_s18  ;;  %304 = vrot.lane.b32.xlu0 %v1286_v12, %s1110_s15 }
 0x13d   : > { %317 = vrot.lane.b32.xlu1 %v1279_v11, %s1108_s24  ;;  %423 = vrot.lane.b32.xlu0 %v1286_v12, %s1107_s23 }
 0x141   : > { %320 = vrot.lane.b32.xlu1 %v1286_v12, %s1109_s25  ;;  %432 = vrot.lane.b32.xlu0 %v1274_v10, %s1103_s19 }
 0x145   : > { %329 = vrot.lane.b32.xlu1 %v1274_v10, %s1104_s20  ;;  %435 = vrot.lane.b32.xlu0 %v1279_v11, %s1101_s17 }
 0x149   : > { %438 = vrot.lane.b32.xlu1 %v1286_v12, %s1102_s18  ;;  %333 = vrot.lane.b32.xlu0 %v1286_v12, %s1108_s24 }
 0x14d   : > { %345 = vrot.lane.b32.xlu1 %v1279_v11, %s1104_s20  ;;  %342 = vrot.lane.b32.xlu0 %v1274_v10, %s1106_s22 }
 0x151   : > { %472 = vrot.lane.b32.xlu1 %v1274_v10, %s1105_s21 }
 0x155   : > { %484 = vrot.lane.b32.xlu1 %v1259_v8, %s1111_s26 }
 0x159   : > { %478 = vrot.lane.b32.xlu1 %v1286_v12, %s1101_s17 }
 0x15d   : > { %493 = vrot.lane.b32.xlu1 %v1286_v12, %s1103_s19 }
 0x161   : > { %502 = vrot.lane.b32.xlu1 %v1274_v10, %s1111_s26 }
 0x165   : > { %508 = vrot.lane.b32.xlu1 %v1286_v12, %s1105_s21 }
 0x169   : > { %517 = vrot.lane.b32.xlu1 %v1274_v10, %s1112_s27 }
 0x18b   : > { %v400_v13 = vpop.permute.xlu1 %399  ;;  %v385_v14 = vpop.permute.xlu0 %384 }
 0x18f   : > { %v415_v15 = vpop.permute.xlu1 %414  ;;  %v314_v16 = vpop.permute.xlu0 %313 }
 0x190   : > { %v323_v46 = vsel %vm307_vm3, %v314_v16, %v1274_v10 }
 0x193   : > { %v430_v17 = vpop.permute.xlu1 %429  ;;  %v327_v18 = vpop.permute.xlu0 %326 }
 0x197   : > { %v1330_v19 = vpop.permute.xlu1 %339  ;;  %v388_v20 = vpop.permute.xlu0 %387 }
 0x198   : > { %v396_v31 = vsel %vm307_vm3, %v385_v14, %v388_v20 }
 0x19b   : > { %v391_v21 = vpop.permute.xlu1 %390  ;;  %v403_v22 = vpop.permute.xlu0 %402 }
 0x19c   : > { %v397_v32 = vsel %vm309_vm2, %v396_v31, %v391_v21  ;;  %v411_v33 = vsel %vm307_vm3, %v400_v13, %v403_v22 }
 0x19f   : > { %v394_v23 = vpop.permute.xlu1 %393  ;;  %v406_v24 = vpop.permute.xlu0 %405 }
 0x1a0   : > { %v398_v34 = vsel %vm311_vm4, %v397_v32, %v394_v23  ;;  %v412_v35 = vsel %vm309_vm2, %v411_v33, %v406_v24 }
 0x1a1   : > { %v445_v39 = vrot.slane %v398_v34, 3 }
 0x1a3   : > { %v297_v25 = vpop.permute.xlu1 %296  ;;  %v409_v26 = vpop.permute.xlu0 %408  ;;  %v462_v51 = vsel %vm370_vm5, %v398_v34, %v445_v39 }
 0x1a4   : > { %v413_v38 = vsel %vm311_vm4, %v412_v35, %v409_v26  ;;  %v308_v41 = vsel %vm307_vm3, %v1259_v8, %v297_v25 }
 0x1a5   : > { %v448_v42 = vrot.slane %v413_v38, 6  ;;  %v450_v52 = vrot.slane %v413_v38, 1 }
 0x1a7   : > { %v301_v27 = vpop.permute.xlu1 %300  ;;  %v418_v28 = vpop.permute.xlu0 %417  ;;  %v463_v54 = vsel %vm372_vm6, %v462_v51, %v448_v42 }
 0x1a8   : > { %v426_v40 = vsel %vm307_vm3, %v415_v15, %v418_v28  ;;  %v310_v47 = vsel %vm309_vm2, %v308_v41, %v301_v27  ;;  %v464_v61 = vsel %vm374_vm7, %v463_v54, %v450_v52 }
 0x1ab   : > { %v421_v29 = vpop.permute.xlu1 %420  ;;  %v305_v30 = vpop.permute.xlu0 %304 }
 0x1ac   : > { %v427_v43 = vsel %vm309_vm2, %v426_v40, %v421_v29  ;;  %v312_v49 = vsel %vm311_vm4, %v310_v47, %v305_v30 }
 0x1ad   : > { %v353_v58 = vrot.slane %v312_v49, 3 }
 0x1af   : > { %v318_v36 = vpop.permute.xlu1 %317  ;;  %v424_v37 = vpop.permute.xlu0 %423  ;;  %v371_v6 = vsel %vm370_vm5, %v312_v49, %v353_v58 }
 0x1b0   : > { %v428_v48 = vsel %vm311_vm4, %v427_v43, %v424_v37  ;;  %v324_v50 = vsel %vm309_vm2, %v323_v46, %v318_v36 }
 0x1b1   : > { %v453_v55 = vrot.slane %v428_v48, 4  ;;  %v455_v62 = vrot.slane %v428_v48, 7 }
 0x1b3   : > { %v321_v44 = vpop.permute.xlu1 %320  ;;  %v433_v45 = vpop.permute.xlu0 %432  ;;  %v465_v1 = vsel %vm376_vm8, %v464_v61, %v453_v55 }
 0x1b4   : > { %v325_v53 = vsel %vm311_vm4, %v324_v50, %v321_v44  ;;  %v441_v63 = vsel %vm307_vm3, %v430_v17, %v433_v45  ;;  %v466_v20 = vsel %vm378_vm9, %v465_v1, %v455_v62 }
 0x1b5   : > { %v356_v60 = vrot.slane %v325_v53, 6  ;;  %v358_v9 = vrot.slane %v325_v53, 1 }
 0x1b7   : > { %v330_v56 = vpop.permute.xlu1 %329  ;;  %v436_v57 = vpop.permute.xlu0 %435  ;;  %v373_v15 = vsel %vm372_vm6, %v371_v6, %v356_v60 }
 0x1b8   : > { %v336_v59 = vsel %vm307_vm3, %v327_v18, %v330_v56  ;;  %v442_v2 = vsel %vm309_vm2, %v441_v63, %v436_v57  ;;  %v375_v24 = vsel %vm374_vm7, %v373_v15, %v358_v9 }
 0x1b9   : > { %v337_v4 = vsel %vm309_vm2, %v336_v59, %v1279_v11 }
 0x1bb   : > { %v439_v3 = vpop.permute.xlu1 %438  ;;  %v334_v5 = vpop.permute.xlu0 %333 }
 0x1bc   : > { %v443_v13 = vsel %vm311_vm4, %v442_v2, %v439_v3  ;;  %v338_v14 = vsel %vm311_vm4, %v337_v4, %v334_v5 }
 0x1bd   : > { %v458_v16 = vrot.slane %v443_v13, 2  ;;  %v460_v17 = vrot.slane %v443_v13, 5  ;;  %v361_v18 = vrot.slane %v338_v14, 4  ;;  %v363_v25 = vrot.slane %v338_v14, 7 }
 0x1bf   : > { %v346_v21 = vpop.permute.xlu1 %345  ;;  %v343_v22 = vpop.permute.xlu0 %342  ;;  %v467_v23 = vsel %vm380_vm10, %v466_v20, %v458_v16  ;;  %v377_v28 = vsel %vm376_vm8, %v375_v24, %v361_v18 }
 0x1c0   : > { %v349_v26 = vsel %vm307_vm3, %v1330_v19, %v343_v22  ;;  %v468_v27 = vsel %vm382_vm11, %v467_v23, %v460_v17  ;;  %v379_v33 = vsel %vm378_vm9, %v377_v28, %v363_v25 }
 0x1c1   : > { %v350_v29 = vsel %vm309_vm2, %v349_v26, %v346_v21  ;;  %878 = vmatpush3.xpose.msk.msra.mxu1 %vm220_vm1, %v468_v27 }
 0x1c2   : > { %v351_v30 = vsel %vm311_vm4, %v350_v29, %v1286_v12  ;;  %882 = vmatprep.subr.mxu1 %v1099_v0 }
 0x1c3   : > { %v366_v31 = vrot.slane %v351_v30, 2  ;;  %v368_v32 = vrot.slane %v351_v30, 5  ;;  %v473_v42 = vpop.permute.xlu1 %472 }
 0x1c5   : > { %v381_v34 = vsel %vm380_vm10, %v379_v33, %v366_v31 }
 0x1c6   : > { %v383_v19 = vsel %vm382_vm11, %v381_v34, %v368_v32 }
 0x1c7   : > { %880 = vmatmul.mubr.msk.f32.vlgmr.msra.gmra.mxu1 %vm220_vm1, %v383_v19  ;;  %v485_v44 = vpop.permute.xlu1 %484 }
 0x1c8   : > { %884 = vmatprep.mubr.msk.f32.mxu1 %vm1100_vm0, %v1099_v0 }
 0x1cb   : > { %v479_v46 = vpop.permute.xlu1 %478 }
 0x1cf   : > { %v494_v47 = vpop.permute.xlu1 %493 }
 0x287   : > { %v626_v35 = vpop.f32.mrf.mxu1 }
 0x288   : > { %v630_v36 = vsel %vm307_vm3, %v626_v35, -inf }
 0x289   : > { %631 = vmax.xlane.f32.xlu0 %v630_v36  ;;  %v881_v37 = vpop.f32.mrf.mxu1 }
 0x29f   : > { %469 = vrot.lane.b32.xlu0 %v1259_v8, %s1113_s28 }
 0x2a3   : > { %475 = vrot.lane.b32.xlu0 %v1279_v11, %s1103_s19 }
 0x2a7   : > { %487 = vrot.lane.b32.xlu0 %v1274_v10, %s1113_s28 }
 0x2ab   : > { %490 = vrot.lane.b32.xlu0 %v1279_v11, %s1105_s21 }
 0x2af   : > { %499 = vrot.lane.b32.xlu0 %v1259_v8, %s1112_s27 }
 0x2b3   : > { %505 = vrot.lane.b32.xlu0 %v1279_v11, %s1113_s28 }
 0x2b7   : > { %514 = vrot.lane.b32.xlu0 %v1259_v8, %s1114_s29 }
 0x2bb   : > { %520 = vrot.lane.b32.xlu0 %v1279_v11, %s1111_s26  ;;  %v503_v11 = vpop.permute.xlu1 %502 }
 0x2bf   : > { %v509_v53 = vpop.permute.xlu1 %508 }
 0x2c3   : > { %v518_v60 = vpop.permute.xlu1 %517 }
 0x312   : > { %v632_v0 = vpop.xlane.xlu0 %631 }
 0x313   : > { %v633_v38 = vsub.f32 %v626_v35, %v632_v0 }
 0x315   : > { %v634_v39 = vmul.f32 1.442695, %v633_v38 }
 0x316   : > { %v470_v41 = vpop.permute.xlu0 %469 }
 0x317   : > { %966 = vpow2.f32 %v634_v39  ;;  %v481_v49 = vsel %vm307_vm3, %v470_v41, %v473_v42 }
 0x31a   : > { %v476_v43 = vpop.permute.xlu0 %475 }
 0x31b   : > { %v482_v50 = vsel %vm309_vm2, %v481_v49, %v476_v43 }
 0x31c   : > { %v483_v54 = vsel %vm311_vm4, %v482_v50, %v479_v46 }
 0x31d   : > { %v530_v58 = vrot.slane %v483_v54, 3 }
 0x31e   : > { %v488_v45 = vpop.permute.xlu0 %487 }
 0x31f   : > { %v496_v51 = vsel %vm307_vm3, %v485_v44, %v488_v45  ;;  %v547_v63 = vsel %vm370_vm5, %v483_v54, %v530_v58 }
 0x322   : > { %v491_v8 = vpop.permute.xlu0 %490 }
 0x324   : > { %v967_v40 = vpop.eup %966 }
 0x325   : > { %v636_v10 = vsel %vm307_vm3, %v967_v40, 0.0 }
 0x326   : > { %637 = vadd.xlane.f32.xlu1 %v636_v10  ;;  %v500_v48 = vpop.permute.xlu0 %499 }
 0x327   : > { %v511_v56 = vsel %vm307_vm3, %v500_v48, %v503_v11 }
 0x32a   : > { %v506_v52 = vpop.permute.xlu0 %505 }
 0x32b   : > { %v512_v57 = vsel %vm309_vm2, %v511_v56, %v506_v52 }
 0x32c   : > { %v513_v62 = vsel %vm311_vm4, %v512_v57, %v509_v53 }
 0x32d   : > { %v538_v3 = vrot.slane %v513_v62, 4  ;;  %v540_v9 = vrot.slane %v513_v62, 7 }
 0x32e   : > { %v515_v59 = vpop.permute.xlu0 %514 }
 0x32f   : > { %v526_v13 = vsel %vm307_vm3, %v515_v59, %v518_v60 }
 0x332   : > { %v521_v5 = vpop.permute.xlu0 %520 }
 0x333   : > { %v527_v15 = vsel %vm309_vm2, %v526_v13, %v521_v5 }
 0x337   : > { %523 = vrot.lane.b32.xlu1 %v1286_v12, %s1113_s28  ;;  %v497_v12 = vsel %vm309_vm2, %v496_v51, %v491_v8 }
 0x338   : > { %v498_v55 = vsel %vm311_vm4, %v497_v12, %v494_v47 }
 0x339   : > { %v533_v61 = vrot.slane %v498_v55, 6  ;;  %v535_v1 = vrot.slane %v498_v55, 1 }
 0x33b   : > { %v548_v2 = vsel %vm372_vm6, %v547_v63, %v533_v61 }
 0x33c   : > { %v549_v6 = vsel %vm374_vm7, %v548_v2, %v535_v1 }
 0x33d   : > { %v550_v14 = vsel %vm376_vm8, %v549_v6, %v538_v3 }
 0x33e   : > { %v551_v21 = vsel %vm378_vm9, %v550_v14, %v540_v9 }
 0x3af   : > { %v638_v4 = vpop.xlane.xlu1 %637 }
 0x3b0   : > { %968 = vrcp.f32 %v638_v4 }
 0x3b3   : > { %v524_v16 = vpop.permute.xlu1 %523 }
 0x3b4   : > { %v528_v17 = vsel %vm311_vm4, %v527_v15, %v524_v16 }
 0x3b5   : > { %v543_v18 = vrot.slane %v528_v17, 2  ;;  %v545_v20 = vrot.slane %v528_v17, 5 }
 0x3b7   : > { %v552_v22 = vsel %vm380_vm10, %v551_v21, %v543_v18 }
 0x3b8   : > { %v553_v23 = vsel %vm382_vm11, %v552_v22, %v545_v20 }
 0x3b9   : > { %883 = vmatpush3.msra.mxu1 %v553_v23 }
 0x3bd   : > { %v969_v24 = vpop.eup %968 }
 0x3be   : > { %v640_v25 = vmul.f32 %v969_v24, %v638_v4 }
 0x3c0   : > { %v641_v26 = vsub.f32 2.0, %v640_v25 }
 0x3c2   : > { %v642_v27 = vmul.f32 %v969_v24, %v641_v26 }
 0x3c4   : > { %v643_v28 = vmul.f32 %v967_v40, %v642_v27 }
 0x3c6   : > { %885 = vmatmul.mubr.msk.f32.vlgmr.msra.gmra.mxu1 %vm307_vm3, %v643_v28 }
 0x486   : > { %v713_v29 = vpop.f32.mrf.mxu1 }
 0x487   : > { %v717_v30 = vsel %vm220_vm1, %v713_v29, 0.0  ;;  %v722_v31 = vmul.f32 %v713_v29, %v713_v29 }
 0x488   : > { %718 = vadd.xlane.f32.xlu0 %v717_v30  ;;  %v886_v32 = vpop.f32.mrf.mxu1 }
 0x489   : > { %v723_v33 = vsel %vm220_vm1, %v722_v31, 0.0 }
 0x48a   : > { %724 = vadd.xlane.f32.xlu1 %v723_v33 }
 0x49b   : > { %749 = vrot.lane.b32.xlu1 %v643_v28, %s1115_s30 }
 0x511   : > { %v719_v34 = vpop.xlane.xlu0 %718 }
 0x512   : > { %v721_v19 = vmul.f32 0.03125, %v719_v34 }
 0x513   : > { %v725_v35 = vpop.xlane.xlu1 %724 }
 0x514   : > { %v727_v36 = vmul.f32 %v721_v19, %v721_v19  ;;  %v726_v37 = vmul.f32 0.03125, %v725_v35  ;;  %v729_v39 = vsub.f32 %v713_v29, %v721_v19 }
 0x516   : > { %v728_v0 = vsub.f32 %v726_v37, %v727_v36 }
 0x517   : > { %v750_v52 = vpop.permute.xlu1 %749 }
 0x518   : > { %v730_v38 = vadd.f32 1e-05, %v728_v0 }
 0x51a   : > { %970 = vrsqrt.f32 %v730_v38 }
 0x527   : > { %v971_v40 = vpop.eup %970 }
 0x528   : > { %v732_v10 = vmul.f32 %v971_v40, %v729_v39 }
 0x52a   : > { %v733_v41 = vadd.f32 %v732_v10, %v1254_v7 }
 0x52c   : > { %v734_v42 = vsel %vm220_vm1, %v733_v41, 0.0  ;;  %v738_v43 = vmul.f32 %v733_v41, %v733_v41 }
 0x52d   : > { %735 = vadd.xlane.f32.xlu0 %v734_v42 }
 0x52e   : > { %v739_v44 = vsel %vm220_vm1, %v738_v43, 0.0 }
 0x531   : > { %740 = vadd.xlane.f32.xlu0 %v739_v44 }
 0x5b6   : > { %v736_v45 = vpop.xlane.xlu0 %735 }
 0x5b7   : > { %v737_v46 = vmul.f32 0.03125, %v736_v45 }
 0x5b9   : > { %v743_v47 = vmul.f32 %v737_v46, %v737_v46  ;;  %v745_v50 = vsub.f32 %v733_v41, %v737_v46 }
 0x5ba   : > { %v741_v8 = vpop.xlane.xlu0 %740 }
 0x5bb   : > { %v742_v48 = vmul.f32 0.03125, %v741_v8 }
 0x5bd   : > { %v744_v11 = vsub.f32 %v742_v48, %v743_v47 }
 0x5bf   : > { %v746_v49 = vadd.f32 1e-05, %v744_v11 }
 0x5c1   : > { %972 = vrsqrt.f32 %v746_v49 }
 0x5ce   : > { %v973_v7 = vpop.eup %972 }
 0x5cf   : > { %v748_v51 = vmul.f32 %v973_v7, %v745_v50 }
 0x5d1   : > { %v752_v53 = vsel %vm220_vm1, %v748_v51, %v750_v52 }
 0x5d2   : > { %754 = vst.msk [vmem:[%s212_s8] sm:$0xff] %vm753_vm12, %v752_v53 }
 0x5d3 PF: > { %p14_p9 = scmp.ge.s32.totalorder %s1198_s5, 4   ;;  %s1454_s12 = smov %s1084_s13 }
 0x5d4   : > { %s1455_s13 = smov %s1088_s14  ;;  %s1456_s14 = smov %s1209_s9 }
 0x5d5   : > { %s1457_s15 = smov %s1198_s5  ;;  %16 = sbr.rel (!%p14_p9) target bundleno = 4 (0x4), region = 80 }
 0x5da   :  { %774 = vsyncpa [#allocation3], 1 }
 0x5db   :  { %776 = vsyncpa [#allocation3 + $0x1], 1 }
 0x5dc   :  { %777 = vsyncpa [#allocation5], 1 }

</bundles_post_ra>
